<compile_context>
chip_gen: v6e
topology: v6e:2x2x1
jax: 0.10.0
libtpu: 0.0.40
codegen_flags: <defaults>
</compile_context>

<pallas_src>
import jax
import jax.numpy as jnp
from jax.experimental import pallas as pl
from jax.experimental.pallas import tpu as pltpu

LANE = 128        # TPU lane width — hidden feature dims are padded to this.
MAX_TILE_B = 2048 # cap on batch-tile rows (per-tile VMEM stays tiny)


def mlp_kernel(x_ref, w1_ref, b1_ref, w2_ref, b2_ref, w3_ref, b3_ref, o_ref):
    # One batch tile per grid step: 3 MXU matmuls (bf16 operands, f32 acc)
    # fused with VPU bias-add + ReLU. Hidden dims are 128-lane padded; the
    # output block is the true out_size (masked store, 16x fewer bytes).
    x = x_ref[...].astype(jnp.bfloat16)                 # (TILE_B, in)
    h1 = jnp.dot(x, w1_ref[...], preferred_element_type=jnp.float32) + b1_ref[...]
    h1 = jnp.maximum(h1, 0.0).astype(jnp.bfloat16)      # (TILE_B, 128)
    h2 = jnp.dot(h1, w2_ref[...], preferred_element_type=jnp.float32) + b2_ref[...]
    h2 = jnp.maximum(h2, 0.0).astype(jnp.bfloat16)      # (TILE_B, 128)
    out = jnp.dot(h2, w3_ref[...], preferred_element_type=jnp.float32) + b3_ref[...]
    o_ref[...] = out                                    # (TILE_B, out_size) f32


def _round_up(n, m):
    return ((n + m - 1) // m) * m


def _pad_to(a, shape):
    pads = tuple((0, t - s) for s, t in zip(a.shape, shape))
    if all(p == (0, 0) for p in pads):
        return a
    return jnp.pad(a, pads)


def _tensorcores_per_chip():
    """v7x exposes 2 TensorCores per chip; v5e/v6e have 1. Default to 1."""
    try:
        kind = jax.devices()[0].device_kind.lower()
    except Exception:
        return 1
    return 2 if "v7" in kind else 1


def _pick_tile_b(batch, n_cores):
    # Aim for one tile per TensorCore (grid=1 on v5e/v6e, grid=2 on v7x) so
    # per-step overhead (~0.35 us) is paid as few times as possible, capped so
    # very large batches still pipeline.
    tile = _round_up(max(1, -(-batch // max(n_cores, 1))), 8)
    tile = max(8, min(tile, MAX_TILE_B))
    return tile


def prepare_params(params):
    """One-time padding + bf16 cast of the weights (call outside the hot path).

    Input params: (w1, b1, w2, b2, w3, b3) with weights stored as (in, out)
    and biases as (1, out), all f32. Hidden dims are zero-padded to 128 lanes;
    the output dim is left at its true size.
    """
    w1, b1, w2, b2, w3, b3 = params
    in_size = w1.shape[0]
    h1p = _round_up(w1.shape[1], LANE)
    h2p = _round_up(w2.shape[1], LANE)
    out_size = w3.shape[1]

    w1p = _pad_to(w1, (in_size, h1p)).astype(jnp.bfloat16)
    b1p = _pad_to(b1, (1, h1p))                                   # f32
    w2p = _pad_to(w2, (h1p, h2p)).astype(jnp.bfloat16)
    b2p = _pad_to(b2, (1, h2p))                                   # f32
    w3p = _pad_to(w3, (h2p, out_size)).astype(jnp.bfloat16)
    b3p = b3                                                      # (1, out) f32
    return (w1p, b1p, w2p, b2p, w3p, b3p)


def net_forward(x, prepared_params, *, tile_b=None):
    """Fused forward pass.

    x: (B, input_size) f32. prepared_params: output of prepare_params().
    Returns (B, output_size) f32.
    """
    w1p, b1p, w2p, b2p, w3p, b3p = prepared_params
    B, in_size = x.shape
    h1p, h2p, out_size = w1p.shape[1], w2p.shape[1], w3p.shape[1]

    if tile_b is None:
        tile_b = _pick_tile_b(B, _tensorcores_per_chip())
    tile_b = max(8, _round_up(min(tile_b, max(B, 1)), 8))

    num_tiles = -(-B // tile_b)
    Bp = num_tiles * tile_b
    # Row padding only if B doesn't divide the tile (demo path: no-op, no copy).
    xp = _pad_to(x, (Bp, in_size))

    flops = 2 * Bp * (in_size * h1p + h1p * h2p + h2p * out_size)
    bytes_accessed = (
        Bp * in_size * 4                                    # x (f32 read)
        + (in_size * h1p + h1p * h2p + h2p * out_size) * 2  # bf16 weights
        + (h1p + h2p + out_size) * 4                        # f32 biases
        + Bp * out_size * 4                                 # f32 output
    )

    const = lambda shape: pl.BlockSpec(shape, lambda i: (0, 0))   # VMEM-resident

    out = pl.pallas_call(
        mlp_kernel,
        out_shape=jax.ShapeDtypeStruct((Bp, out_size), jnp.float32),
        grid=(num_tiles,),
        in_specs=[
            pl.BlockSpec((tile_b, in_size), lambda i: (i, 0)),    # x: tiled over batch
            const(w1p.shape), const(b1p.shape),
            const(w2p.shape), const(b2p.shape),
            const(w3p.shape), const(b3p.shape),
        ],
        out_specs=pl.BlockSpec((tile_b, out_size), lambda i: (i, 0)),
        compiler_params=pltpu.CompilerParams(
            dimension_semantics=("parallel",),        # megacore split on v7x
            vmem_limit_bytes=32 * 1024 * 1024,        # ample headroom on v5e/v6e/v7x
        ),
        cost_estimate=pl.CostEstimate(
            flops=flops, transcendentals=0, bytes_accessed=bytes_accessed
        ),
    )(xp, w1p, b1p, w2p, b2p, w3p, b3p)

    return out if Bp == B else out[:B]


def init_params(key, input_size, hidden1_size, hidden2_size, output_size):
    """Deterministic init mimicking nn.Linear's U(-1/sqrt(fan_in), 1/sqrt(fan_in))."""
    def linear(k, fan_in, fan_out):
        kw, kb = jax.random.split(k)
        bound = 1.0 / jnp.sqrt(jnp.float32(fan_in))
        # stored as (in, out) so the kernel computes x @ W (PyTorch does x @ W.T)
        w = jax.random.uniform(kw, (fan_in, fan_out), jnp.float32, -bound, bound)
        b = jax.random.uniform(kb, (1, fan_out), jnp.float32, -bound, bound)
        return w, b

    k1, k2, k3 = jax.random.split(key, 3)
    w1, b1 = linear(k1, input_size, hidden1_size)
    w2, b2 = linear(k2, hidden1_size, hidden2_size)
    w3, b3 = linear(k3, hidden2_size, output_size)
    return (w1, b1, w2, b2, w3, b3)


def reference_forward_f32(x, params):
    w1, b1, w2, b2, w3, b3 = params
    h1 = jnp.maximum(x @ w1 + b1, 0.0)
    h2 = jnp.maximum(h1 @ w2 + b2, 0.0)
    return h2 @ w3 + b3


def reference_forward_bf16(x, params):
    # Same mixed-precision recipe as the kernel (bf16 operands, f32 accumulate).
    w1, b1, w2, b2, w3, b3 = params
    xb = x.astype(jnp.bfloat16)
    h1 = jnp.maximum(
        jnp.dot(xb, w1.astype(jnp.bfloat16), preferred_element_type=jnp.float32) + b1, 0.0
    ).astype(jnp.bfloat16)
    h2 = jnp.maximum(
        jnp.dot(h1, w2.astype(jnp.bfloat16), preferred_element_type=jnp.float32) + b2, 0.0
    ).astype(jnp.bfloat16)
    return jnp.dot(h2, w3.astype(jnp.bfloat16), preferred_element_type=jnp.float32) + b3


if __name__ == "__main__":
    input_size, hidden1_size, hidden2_size, output_size = 16, 32, 32, 8
    batch = 256

    key = jax.random.PRNGKey(0)
    kx, kp = jax.random.split(key)
    x = jax.random.normal(kx, (batch, input_size), jnp.float32)
    params = init_params(kp, input_size, hidden1_size, hidden2_size, output_size)

    # One-time weight prep (padding + bf16 cast), hoisted out of the hot path.
    prepared = jax.tree_util.tree_map(jax.block_until_ready, prepare_params(params))

    fwd = jax.jit(net_forward)
    out = jax.block_until_ready(fwd(x, prepared))

    assert out.shape == (batch, output_size)
    # Tight check against a reference using the identical bf16/f32 recipe.
    ref_mixed = reference_forward_bf16(x, params)
    assert jnp.allclose(out, ref_mixed, atol=1e-3, rtol=1e-3)
    # Loose check against the pure-f32 reference (bf16 operand rounding only).
    ref_f32 = reference_forward_f32(x, params)
    assert jnp.allclose(out, ref_f32, atol=3e-2, rtol=3e-2)

    print("KERNEL_OK")
</pallas_src>

<mosaic_0001>
module attributes {stable_mosaic.version = 11 : i64} {
  func.func @mlp_kernel(%arg0: i32, %arg1: memref<256x16xf32, #tpu.memory_space<vmem>>, %arg2: memref<16x128xbf16, #tpu.memory_space<vmem>>, %arg3: memref<1x128xf32, #tpu.memory_space<vmem>>, %arg4: memref<128x128xbf16, #tpu.memory_space<vmem>>, %arg5: memref<1x128xf32, #tpu.memory_space<vmem>>, %arg6: memref<128x8xbf16, #tpu.memory_space<vmem>>, %arg7: memref<1x8xf32, #tpu.memory_space<vmem>>, %arg8: memref<256x8xf32, #tpu.memory_space<vmem>>) attributes {dimension_semantics = [#tpu.dimension_semantics<parallel>], iteration_bounds = array<i64: 1>, scalar_prefetch = 0 : i64, scratch_operands = 0 : i64, tpu.core_type = #tpu.core_type<tc>, window_params = [{transform_indices = @transform_0, window_bounds = array<i64: 256, 16>}, {pipeline_mode = #tpu.pipeline_mode<synchronous>, transform_indices = @transform_1, window_bounds = array<i64: 16, 128>}, {pipeline_mode = #tpu.pipeline_mode<synchronous>, transform_indices = @transform_2, window_bounds = array<i64: 1, 128>}, {pipeline_mode = #tpu.pipeline_mode<synchronous>, transform_indices = @transform_3, window_bounds = array<i64: 128, 128>}, {pipeline_mode = #tpu.pipeline_mode<synchronous>, transform_indices = @transform_4, window_bounds = array<i64: 1, 128>}, {pipeline_mode = #tpu.pipeline_mode<synchronous>, transform_indices = @transform_5, window_bounds = array<i64: 128, 8>}, {pipeline_mode = #tpu.pipeline_mode<synchronous>, transform_indices = @transform_6, window_bounds = array<i64: 1, 8>}, {transform_indices = @transform_7, window_bounds = array<i64: 256, 8>}]} {
    %c0 = arith.constant 0 : index
    %c0_0 = arith.constant 0 : index
    %0 = vector.load %arg1[%c0, %c0_0] : memref<256x16xf32, #tpu.memory_space<vmem>>, vector<256x16xf32>
    %1 = arith.truncf %0 : vector<256x16xf32> to vector<256x16xbf16>
    %c0_1 = arith.constant 0 : index
    %c0_2 = arith.constant 0 : index
    %2 = vector.load %arg2[%c0_1, %c0_2] : memref<16x128xbf16, #tpu.memory_space<vmem>>, vector<16x128xbf16>
    %cst = arith.constant dense<0.000000e+00> : vector<256x128xf32>
    %3 = tpu.matmul %1, %2, %cst {dimension_numbers = #tpu.dot_dimension_numbers<[1], [0], [0], [1], [0, 0, 1, 1], [], []>} : vector<256x16xbf16>, vector<16x128xbf16>, vector<256x128xf32> -> vector<256x128xf32>
    %c0_3 = arith.constant 0 : index
    %c0_4 = arith.constant 0 : index
    %4 = vector.load %arg3[%c0_3, %c0_4] : memref<1x128xf32, #tpu.memory_space<vmem>>, vector<1x128xf32>
    %5 = vector.broadcast %4 : vector<1x128xf32> to vector<256x128xf32>
    %6 = arith.addf %3, %5 : vector<256x128xf32>
    %cst_5 = arith.constant 0.000000e+00 : f32
    %7 = vector.broadcast %cst_5 : f32 to vector<256x128xf32>
    %8 = arith.maximumf %6, %7 : vector<256x128xf32>
    %9 = arith.truncf %8 : vector<256x128xf32> to vector<256x128xbf16>
    %c0_6 = arith.constant 0 : index
    %c0_7 = arith.constant 0 : index
    %10 = vector.load %arg4[%c0_6, %c0_7] : memref<128x128xbf16, #tpu.memory_space<vmem>>, vector<128x128xbf16>
    %cst_8 = arith.constant dense<0.000000e+00> : vector<256x128xf32>
    %11 = tpu.matmul %9, %10, %cst_8 {dimension_numbers = #tpu.dot_dimension_numbers<[1], [0], [0], [1], [0, 0, 1, 1], [], []>} : vector<256x128xbf16>, vector<128x128xbf16>, vector<256x128xf32> -> vector<256x128xf32>
    %c0_9 = arith.constant 0 : index
    %c0_10 = arith.constant 0 : index
    %12 = vector.load %arg5[%c0_9, %c0_10] : memref<1x128xf32, #tpu.memory_space<vmem>>, vector<1x128xf32>
    %13 = vector.broadcast %12 : vector<1x128xf32> to vector<256x128xf32>
    %14 = arith.addf %11, %13 : vector<256x128xf32>
    %cst_11 = arith.constant 0.000000e+00 : f32
    %15 = vector.broadcast %cst_11 : f32 to vector<256x128xf32>
    %16 = arith.maximumf %14, %15 : vector<256x128xf32>
    %17 = arith.truncf %16 : vector<256x128xf32> to vector<256x128xbf16>
    %c0_12 = arith.constant 0 : index
    %c0_13 = arith.constant 0 : index
    %18 = vector.load %arg6[%c0_12, %c0_13] : memref<128x8xbf16, #tpu.memory_space<vmem>>, vector<128x8xbf16>
    %cst_14 = arith.constant dense<0.000000e+00> : vector<256x8xf32>
    %19 = tpu.matmul %17, %18, %cst_14 {dimension_numbers = #tpu.dot_dimension_numbers<[1], [0], [0], [1], [0, 0, 1, 1], [], []>} : vector<256x128xbf16>, vector<128x8xbf16>, vector<256x8xf32> -> vector<256x8xf32>
    %c0_15 = arith.constant 0 : index
    %c0_16 = arith.constant 0 : index
    %20 = vector.load %arg7[%c0_15, %c0_16] : memref<1x8xf32, #tpu.memory_space<vmem>>, vector<1x8xf32>
    %21 = vector.broadcast %20 : vector<1x8xf32> to vector<256x8xf32>
    %22 = arith.addf %19, %21 : vector<256x8xf32>
    %c0_17 = arith.constant 0 : index
    %c0_18 = arith.constant 0 : index
    %23 = vector.load %arg8[%c0_17, %c0_18] : memref<256x8xf32, #tpu.memory_space<vmem>>, vector<256x8xf32>
    tpu.vector_store %arg8[%c0_17, %c0_18], %22 {strides = array<i32>} : memref<256x8xf32, #tpu.memory_space<vmem>>, vector<256x8xf32>,
    return
  }
  func.func @transform_0(%arg0: i32) -> (i32, i32) {
    %c0_i32 = arith.constant 0 : i32
    %c0_i32_0 = arith.constant 0 : i32
    return %arg0, %c0_i32 : i32, i32
  }
  func.func @transform_1(%arg0: i32) -> (i32, i32) {
    %c0_i32 = arith.constant 0 : i32
    %c0_i32_0 = arith.constant 0 : i32
    %c0_i32_1 = arith.constant 0 : i32
    return %c0_i32, %c0_i32_0 : i32, i32
  }
  func.func @transform_2(%arg0: i32) -> (i32, i32) {
    %c0_i32 = arith.constant 0 : i32
    %c0_i32_0 = arith.constant 0 : i32
    %c0_i32_1 = arith.constant 0 : i32
    return %c0_i32, %c0_i32_0 : i32, i32
  }
  func.func @transform_3(%arg0: i32) -> (i32, i32) {
    %c0_i32 = arith.constant 0 : i32
    %c0_i32_0 = arith.constant 0 : i32
    %c0_i32_1 = arith.constant 0 : i32
    return %c0_i32, %c0_i32_0 : i32, i32
  }
  func.func @transform_4(%arg0: i32) -> (i32, i32) {
    %c0_i32 = arith.constant 0 : i32
    %c0_i32_0 = arith.constant 0 : i32
    %c0_i32_1 = arith.constant 0 : i32
    return %c0_i32, %c0_i32_0 : i32, i32
  }
  func.func @transform_5(%arg0: i32) -> (i32, i32) {
    %c0_i32 = arith.constant 0 : i32
    %c0_i32_0 = arith.constant 0 : i32
    %c0_i32_1 = arith.constant 0 : i32
    return %c0_i32, %c0_i32_0 : i32, i32
  }
  func.func @transform_6(%arg0: i32) -> (i32, i32) {
    %c0_i32 = arith.constant 0 : i32
    %c0_i32_0 = arith.constant 0 : i32
    %c0_i32_1 = arith.constant 0 : i32
    return %c0_i32, %c0_i32_0 : i32, i32
  }
  func.func @transform_7(%arg0: i32) -> (i32, i32) {
    %c0_i32 = arith.constant 0 : i32
    %c0_i32_0 = arith.constant 0 : i32
    return %arg0, %c0_i32 : i32, i32
  }
}

</mosaic_0001>

<bundles_post_ra>
// kernel: net_forward.1
= control target key start
LH: loop header
LB: loop body
LE: loop exit
PB: predicated region body
PF: predicated region fallthrough
CT: control target
= control target key end

     0   :  { %vm90_vm0 = vcmask 130048   ;;  %vm860_vm1 = vcmask 64512   ;;  %s1604_s1 = inlined_call_operand.vmem [shape: bf16[16,128], index: 1, kind: input, shape index: {}]   ;;  %s1605_s0 = inlined_call_operand.vmem [shape: f32[256,16], index: 0, kind: input, shape index: {}]   ;;  %s1606_s3 = inlined_call_operand.vmem [shape: bf16[128,128], index: 3, kind: input, shape index: {}]   ;;  %s1607_s5 = inlined_call_operand.vmem [shape: bf16[128,8], index: 5, kind: input, shape index: {}]   ;;  %s1608_s2 = inlined_call_operand.vmem [shape: f32[1,128], index: 2, kind: input, shape index: {}]   ;;  %s1609_s4 = inlined_call_operand.vmem [shape: f32[1,128], index: 4, kind: input, shape index: {}]   ;;  %s1610_s6 = inlined_call_operand.vmem [shape: f32[1,8], index: 6, kind: input, shape index: {}]   ;;  %s1611_s7 = inlined_call_operand.vmem [shape: f32[256,8], index: 7, kind: output, shape index: {}]  }
   0x1   :  { %v1130_v0 = vld [vmem:[%s1604_s1] sm:$0xff]   ;;  %v28_v2 = vld [vmem:[%s1605_s0 + $0x8] sm:$0xff]  ;;  %v29_v3 = vld [vmem:[%s1605_s0 + $0x10] sm:$0xff] }
   0x2   :  { %v27_v1 = vld [vmem:[%s1605_s0] sm:$0xff]  ;;  %998 = vmatprep.subr.bf16.mxu0 %v1130_v0  ;;  %v30_v5 = vld [vmem:[%s1605_s0 + $0x18] sm:$0xff]  ;;  %v32_v7 = vld [vmem:[%s1605_s0 + $0x28] sm:$0xff]  ;;  %1128 = vmatprep.subr.bf16.mxu1 %v1130_v0 }
   0x3   :  { %v59_v4 = vpack.c.bf16 %v28_v2, %v27_v1  ;;  %v31_v6 = vld [vmem:[%s1605_s0 + $0x20] sm:$0xff]  ;;  %999 = vmatpush3.bf16.msra.mxu0 %v1130_v0  ;;  %v60_v8 = vpack.c.bf16 %v30_v5, %v29_v3  ;;  %1129 = vmatpush3.bf16.msra.mxu1 %v1130_v0  ;;  %v33_v10 = vld [vmem:[%s1605_s0 + $0x30] sm:$0xff]  ;;  %v34_v11 = vld [vmem:[%s1605_s0 + $0x38] sm:$0xff] }
   0x4   :  { %v61_v9 = vpack.c.bf16 %v32_v7, %v31_v6  ;;  %v43_v12 = vld [vmem:[%s1605_s0 + $0x80] sm:$0xff]  ;;  %v44_v13 = vld [vmem:[%s1605_s0 + $0x88] sm:$0xff]  ;;  %v45_v15 = vld [vmem:[%s1605_s0 + $0x90] sm:$0xff]  ;;  %v62_v23 = vpack.c.bf16 %v34_v11, %v33_v10 }
   0x5   :  { %1000 = vmatprep.mubr.msk.bf16.mxu0 %vm90_vm0, %v59_v4  ;;  %v67_v14 = vpack.c.bf16 %v44_v13, %v43_v12  ;;  %v46_v16 = vld [vmem:[%s1605_s0 + $0x98] sm:$0xff]  ;;  %v47_v17 = vld [vmem:[%s1605_s0 + $0xa0] sm:$0xff]  ;;  %v36_v19 = vld [vmem:[%s1605_s0 + $0x48] sm:$0xff] }
   0x6   :  { %1001 = vmatmul.mubr.msk.bf16.vlgmr.msra.gmra.mxu0 %vm90_vm0, %v60_v8  ;;  %v35_v18 = vld [vmem:[%s1605_s0 + $0x40] sm:$0xff]  ;;  %v68_v20 = vpack.c.bf16 %v46_v16, %v45_v15  ;;  %v48_v21 = vld [vmem:[%s1605_s0 + $0xa8] sm:$0xff]  ;;  %v49_v24 = vld [vmem:[%s1605_s0 + $0xb0] sm:$0xff] }
   0x7   :  { %1004 = vmatprep.mubr.msk.bf16.mxu0 %vm90_vm0, %v61_v9  ;;  %1016 = vmatprep.mubr.msk.bf16.mxu1 %vm90_vm0, %v67_v14  ;;  %v69_v22 = vpack.c.bf16 %v48_v21, %v47_v17  ;;  %v50_v25 = vld [vmem:[%s1605_s0 + $0xb8] sm:$0xff]  ;;  %v63_v26 = vpack.c.bf16 %v36_v19, %v35_v18  ;;  %v51_v27 = vld [vmem:[%s1605_s0 + $0xc0] sm:$0xff]  ;;  %v52_v28 = vld [vmem:[%s1605_s0 + $0xc8] sm:$0xff] }
   0x8   :  { %1017 = vmatmul.mubr.msk.bf16.vlgmr.msra.gmra.mxu1 %vm90_vm0, %v68_v20  ;;  %v1131_v29 = vld [vmem:[%s1606_s3 + $0x38] sm:$0xff]   ;;  %v37_v30 = vld [vmem:[%s1605_s0 + $0x50] sm:$0xff]  ;;  %v39_v33 = vld [vmem:[%s1605_s0 + $0x60] sm:$0xff]  ;;  %v70_v34 = vpack.c.bf16 %v50_v25, %v49_v24  ;;  %v71_v36 = vpack.c.bf16 %v52_v28, %v51_v27 }
   0x9   :  { %1020 = vmatprep.mubr.msk.bf16.mxu1 %vm90_vm0, %v69_v22  ;;  %v38_v31 = vld [vmem:[%s1605_s0 + $0x58] sm:$0xff]  ;;  %v1132_v32 = vld [vmem:[%s1606_s3 + $0x30] sm:$0xff]   ;;  %1032 = vmatprep.subr.bf16.mxu1 %v1131_v29  ;;  %v40_v35 = vld [vmem:[%s1605_s0 + $0x68] sm:$0xff] }
   0xa   :  { %1033 = vmatpush3.bf16.msra.mxu1 %v1131_v29  ;;  %v1133_v37 = vld [vmem:[%s1606_s3 + $0x28] sm:$0xff]   ;;  %v64_v38 = vpack.c.bf16 %v38_v31, %v37_v30  ;;  %v65_v39 = vpack.c.bf16 %v40_v35, %v39_v33  ;;  %v53_v40 = vld [vmem:[%s1605_s0 + $0xd0] sm:$0xff]  ;;  %v54_v41 = vld [vmem:[%s1605_s0 + $0xd8] sm:$0xff] }
   0xb   :  { %1034 = vmatprep.subr.bf16.mxu1 %v1132_v32  ;;  %v55_v42 = vld [vmem:[%s1605_s0 + $0xe0] sm:$0xff]  ;;  %v56_v43 = vld [vmem:[%s1605_s0 + $0xe8] sm:$0xff]  ;;  %v72_v45 = vpack.c.bf16 %v54_v41, %v53_v40  ;;  %v41_v46 = vld [vmem:[%s1605_s0 + $0x70] sm:$0xff] }
   0xc   :  { %v1134_v44 = vld [vmem:[%s1606_s3 + $0x20] sm:$0xff]   ;;  %v42_v47 = vld [vmem:[%s1605_s0 + $0x78] sm:$0xff]  ;;  %v73_v48 = vpack.c.bf16 %v56_v43, %v55_v42  ;;  %v57_v51 = vld [vmem:[%s1605_s0 + $0xf0] sm:$0xff] }
   0xd   :  { %v1135_v49 = vld [vmem:[%s1606_s3 + $0x18] sm:$0xff]   ;;  %v66_v50 = vpack.c.bf16 %v42_v47, %v41_v46  ;;  %v1136_v54 = vld [vmem:[%s1606_s3 + $0x10] sm:$0xff]   ;;  %v1137_v55 = vld [vmem:[%s1606_s3 + $0x8] sm:$0xff]  }
   0xe   :  { %1005 = vmatmul.mubr.msk.bf16.gmra.mxu0 %vm90_vm0, %v62_v23  ;;  %1035 = vmatpush3.bf16.msra.mxu1 %v1132_v32  ;;  %v58_v52 = vld [vmem:[%s1605_s0 + $0xf8] sm:$0xff]  ;;  %v1138_v56 = vld [vmem:[%s1606_s3] sm:$0xff]   ;;  %v1140_v58 = vld [vmem:[%s1607_s5 + $0x30] sm:$0xff]  }
   0xf   :  { %1008 = vmatprep.mubr.msk.bf16.mxu0 %vm90_vm0, %v63_v26  ;;  %1036 = vmatprep.subr.bf16.mxu1 %v1133_v37  ;;  %v74_v53 = vpack.c.bf16 %v58_v52, %v57_v51  ;;  %v1139_v57 = vld [vmem:[%s1607_s5 + $0x38] sm:$0xff]   ;;  %v1141_v59 = vld [vmem:[%s1607_s5 + $0x28] sm:$0xff]   ;;  %v1142_v60 = vld [vmem:[%s1607_s5 + $0x20] sm:$0xff]  }
  0x10   :  { %1021 = vmatmul.mubr.msk.bf16.gmra.mxu1 %vm90_vm0, %v70_v34  ;;  %1080 = vmatprep.subr.bf16.mxu0 %v1139_v57  ;;  %v1143_v61 = vld [vmem:[%s1607_s5 + $0x18] sm:$0xff]   ;;  %v1344_v0 = vld [vmem:[%s1608_s2] ss:$0 sm:$0xff] }
  0x11   :  { %1024 = vmatprep.mubr.msk.bf16.mxu1 %vm90_vm0, %v71_v36  ;;  %1081 = vmatpush3.bf16.msra.mxu0 %v1139_v57 }
  0x12   :  { %1037 = vmatpush3.bf16.msra.mxu1 %v1133_v37  ;;  %1082 = vmatprep.subr.bf16.mxu0 %v1140_v58 }
  0x13   :  { %1038 = vmatprep.subr.bf16.mxu1 %v1134_v44 }
  0x15   :  { %1083 = vmatpush3.bf16.msra.mxu0 %v1140_v58 }
  0x16   :  { %1009 = vmatmul.mubr.msk.bf16.gmra.mxu0 %vm90_vm0, %v64_v38  ;;  %1039 = vmatpush3.bf16.msra.mxu1 %v1134_v44 }
  0x17   :  { %1012 = vmatprep.mubr.msk.bf16.mxu0 %vm90_vm0, %v65_v39  ;;  %1040 = vmatprep.subr.bf16.mxu1 %v1135_v49 }
  0x18   :  { %1025 = vmatmul.mubr.msk.bf16.gmra.mxu1 %vm90_vm0, %v72_v45  ;;  %1084 = vmatprep.subr.bf16.mxu0 %v1141_v59 }
  0x19   :  { %1028 = vmatprep.mubr.msk.bf16.mxu1 %vm90_vm0, %v73_v48  ;;  %1085 = vmatpush3.bf16.msra.mxu0 %v1141_v59 }
  0x1a   :  { %1041 = vmatpush3.bf16.msra.mxu1 %v1135_v49  ;;  %1086 = vmatprep.subr.bf16.mxu0 %v1142_v60 }
  0x1b   :  { %1042 = vmatprep.subr.bf16.mxu1 %v1136_v54 }
  0x1d   :  { %1087 = vmatpush3.bf16.msra.mxu0 %v1142_v60 }
  0x1e   :  { %1013 = vmatmul.mubr.msk.bf16.gmra.mxu0 %vm90_vm0, %v66_v50  ;;  %1043 = vmatpush3.bf16.msra.mxu1 %v1136_v54 }
  0x1f   :  { %1044 = vmatprep.subr.bf16.mxu1 %v1137_v55  ;;  %1088 = vmatprep.subr.bf16.mxu0 %v1143_v61 }
  0x20   :  { %1029 = vmatmul.mubr.msk.bf16.gmra.mxu1 %vm90_vm0, %v74_v53 }
  0x21   :  { %1089 = vmatpush3.bf16.msra.mxu0 %v1143_v61 }
  0x22   :  { %1045 = vmatpush3.bf16.msra.mxu1 %v1137_v55 }
  0x23   :  { %1046 = vmatprep.subr.bf16.mxu1 %v1138_v56 }
  0x26   :  { %1047 = vmatpush3.bf16.msra.mxu1 %v1138_v56 }
  0xc6   :  { %v1002_v62 = vpop.f32.mrf.mxu0 }
  0xc7   :  { %v182_v5 = vadd.f32 %v1002_v62, %v1344_v0 }
  0xc8   :  { %v173_v63 = vpop.f32.mrf.mxu0  ;;  %v1346_v2 = vpop.f32.mrf.mxu1 }
  0xc9   :  { %v174_v3 = vadd.f32 %v1344_v0, %v173_v63  ;;  %v302_v14 = vmax.f32 %v182_v5, 0.0 }
  0xca   :  { %v1003_v1 = vpop.f32.mrf.mxu0  ;;  %v237_v7 = vpop.f32.mrf.mxu1 }
  0xcb   :  { %v185_v4 = vadd.f32 %v1003_v1, %v1344_v0  ;;  %v300_v12 = vmax.f32 %v174_v3, 0.0  ;;  %v238_v52 = vadd.f32 %v1344_v0, %v237_v7 }
  0xcc   :  { %v176_v6 = vpop.f32.mrf.mxu0  ;;  %v1352_v11 = vpop.f32.mrf.mxu1 }
  0xcd   :  { %v177_v8 = vadd.f32 %v1344_v0, %v176_v6  ;;  %v303_v9 = vmax.f32 %v185_v4, 0.0  ;;  %v316_v61 = vmax.f32 %v238_v52, 0.0  ;;  %v1405_v52 = vld [vmem:[%s1609_s4] ss:$0 sm:$0xff] }
  0xce   :  { %v1006_v10 = vpop.f32.mrf.mxu0  ;;  %v240_v16 = vpop.f32.mrf.mxu1 }
  0xcf   :  { %v301_v13 = vmax.f32 %v177_v8, 0.0  ;;  %v333_v18 = vpack.c.bf16 %v303_v9, %v302_v14  ;;  %v198_v23 = vadd.f32 %v1006_v10, %v1344_v0  ;;  %v241_v53 = vadd.f32 %v1344_v0, %v240_v16 }
  0xd0   :  { %v189_v15 = vpop.f32.mrf.mxu0  ;;  %v1354_v20 = vpop.f32.mrf.mxu1  ;;  %v249_v14 = vadd.f32 %v1352_v11, %v1344_v0 }
  0xd1   :  { %v332_v17 = vpack.c.bf16 %v301_v13, %v300_v12  ;;  %v190_v21 = vadd.f32 %v1344_v0, %v189_v15  ;;  %v306_v32 = vmax.f32 %v198_v23, 0.0  ;;  %v317_v63 = vmax.f32 %v241_v53, 0.0 }
  0xd2   :  { %v1007_v19 = vpop.f32.mrf.mxu0  ;;  %v253_v25 = vpop.f32.mrf.mxu1  ;;  %v246_v12 = vadd.f32 %v1346_v2, %v1344_v0  ;;  %v262_v2 = vadd.f32 %v1354_v20, %v1344_v0 }
  0xd3   :  { %v201_v22 = vadd.f32 %v1007_v19, %v1344_v0  ;;  %1048 = vmatprep.mubr.bf16.mxu1 %v332_v17  ;;  %v304_v30 = vmax.f32 %v190_v21, 0.0  ;;  %v340_v8 = vpack.c.bf16 %v317_v63, %v316_v61  ;;  %v254_v9 = vadd.f32 %v1344_v0, %v253_v25 }
  0xd4   :  { %v192_v24 = vpop.f32.mrf.mxu0  ;;  %1049 = vmatmul.mubr.bf16.vlgmr.msra.gmra.mxu1 %v333_v18  ;;  %v1360_v29 = vpop.f32.mrf.mxu1  ;;  %v318_v18 = vmax.f32 %v246_v12, 0.0  ;;  %v319_v19 = vmax.f32 %v249_v14, 0.0 }
  0xd5   :  { %v193_v26 = vadd.f32 %v1344_v0, %v192_v24  ;;  %v307_v27 = vmax.f32 %v201_v22, 0.0  ;;  %v320_v16 = vmax.f32 %v254_v9, 0.0  ;;  %v265_v11 = vadd.f32 %v1360_v29, %v1344_v0 }
  0xd6   :  { %v1010_v28 = vpop.f32.mrf.mxu0  ;;  %v256_v34 = vpop.f32.mrf.mxu1  ;;  %v341_v25 = vpack.c.bf16 %v319_v19, %v318_v18 }
  0xd7   :  { %v305_v31 = vmax.f32 %v193_v26, 0.0  ;;  %v335_v36 = vpack.c.bf16 %v307_v27, %v306_v32  ;;  %v214_v41 = vadd.f32 %v1010_v28, %v1344_v0  ;;  %v257_v10 = vadd.f32 %v1344_v0, %v256_v34 }
  0xd8   :  { %v205_v33 = vpop.f32.mrf.mxu0  ;;  %v1362_v38 = vpop.f32.mrf.mxu1 }
  0xd9   :  { %v334_v35 = vpack.c.bf16 %v305_v31, %v304_v30  ;;  %v206_v39 = vadd.f32 %v1344_v0, %v205_v33  ;;  %v310_v49 = vmax.f32 %v214_v41, 0.0  ;;  %v321_v17 = vmax.f32 %v257_v10, 0.0 }
  0xda   :  { %v1011_v37 = vpop.f32.mrf.mxu0  ;;  %v269_v46 = vpop.f32.mrf.mxu1  ;;  %v322_v30 = vmax.f32 %v262_v2, 0.0  ;;  %v323_v31 = vmax.f32 %v265_v11, 0.0  ;;  %v278_v20 = vadd.f32 %v1362_v38, %v1344_v0  ;;  %v1144_v38 = vld [vmem:[%s1607_s5 + $0x10] sm:$0xff]  }
  0xdb   :  { %v217_v40 = vadd.f32 %v1011_v37, %v1344_v0  ;;  %1052 = vmatprep.mubr.bf16.mxu1 %v334_v35  ;;  %v308_v47 = vmax.f32 %v206_v39, 0.0  ;;  %v342_v22 = vpack.c.bf16 %v321_v17, %v320_v16  ;;  %v270_v23 = vadd.f32 %v1344_v0, %v269_v46  ;;  %1090 = vmatprep.subr.bf16.mxu0 %v1144_v38 }
  0xdc   :  { %v208_v42 = vpop.f32.mrf.mxu0  ;;  %1053 = vmatmul.mubr.bf16.gmra.mxu1 %v335_v36  ;;  %v1027_v56 = vpop.f32.mrf.mxu1  ;;  %v343_v36 = vpack.c.bf16 %v323_v31, %v322_v30  ;;  %1091 = vmatpush3.bf16.msra.mxu0 %v1144_v38 }
  0xdd   :  { %v209_v43 = vadd.f32 %v1344_v0, %v208_v42  ;;  %v311_v44 = vmax.f32 %v217_v40, 0.0  ;;  %v324_v27 = vmax.f32 %v270_v23, 0.0  ;;  %v281_v37 = vadd.f32 %v1027_v56, %v1344_v0 }
  0xde   :  { %v1014_v45 = vpop.f32.mrf.mxu0  ;;  %v272_v3 = vpop.f32.mrf.mxu1  ;;  %v326_v40 = vmax.f32 %v278_v20, 0.0 }
  0xdf   :  { %v309_v48 = vmax.f32 %v209_v43, 0.0  ;;  %v337_v54 = vpack.c.bf16 %v311_v44, %v310_v49  ;;  %v230_v59 = vadd.f32 %v1014_v45, %v1344_v0  ;;  %v273_v24 = vadd.f32 %v1344_v0, %v272_v3  ;;  %v1145_v49 = vld [vmem:[%s1607_s5 + $0x8] sm:$0xff]  }
  0xe0   :  { %v221_v50 = vpop.f32.mrf.mxu0  ;;  %v1030_v15 = vpop.f32.mrf.mxu1  ;;  %v327_v41 = vmax.f32 %v281_v37, 0.0  ;;  %1092 = vmatprep.subr.bf16.mxu0 %v1145_v49 }
  0xe1   :  { %v336_v51 = vpack.c.bf16 %v309_v48, %v308_v47  ;;  %v222_v57 = vadd.f32 %v1344_v0, %v221_v50  ;;  %v314_v6 = vmax.f32 %v230_v59, 0.0  ;;  %v325_v28 = vmax.f32 %v273_v24, 0.0  ;;  %1093 = vmatpush3.bf16.msra.mxu0 %v1145_v49 }
  0xe2   :  { %v1015_v55 = vpop.f32.mrf.mxu0  ;;  %v285_v21 = vpop.f32.mrf.mxu1  ;;  %v345_v43 = vpack.c.bf16 %v327_v41, %v326_v40  ;;  %v294_v44 = vadd.f32 %v1030_v15, %v1344_v0 }
  0xe3   :  { %v233_v58 = vadd.f32 %v1015_v55, %v1344_v0  ;;  %1056 = vmatprep.mubr.bf16.mxu1 %v336_v51  ;;  %v312_v4 = vmax.f32 %v222_v57, 0.0  ;;  %v344_v33 = vpack.c.bf16 %v325_v28, %v324_v27  ;;  %v286_v34 = vadd.f32 %v1344_v0, %v285_v21 }
  0xe4   :  { %v224_v60 = vpop.f32.mrf.mxu0  ;;  %1057 = vmatmul.mubr.bf16.gmra.mxu1 %v337_v54  ;;  %v1031_v26 = vpop.f32.mrf.mxu1  ;;  %v330_v46 = vmax.f32 %v294_v44, 0.0 }
  0xe5   :  { %v225_v62 = vadd.f32 %v1344_v0, %v224_v60  ;;  %v315_v1 = vmax.f32 %v233_v58, 0.0  ;;  %v328_v29 = vmax.f32 %v286_v34, 0.0  ;;  %v297_v45 = vadd.f32 %v1031_v26, %v1344_v0 }
  0xe6   :  { %v288_v32 = vpop.f32.mrf.mxu1 }
  0xe7   :  { %v313_v5 = vmax.f32 %v225_v62, 0.0  ;;  %v339_v13 = vpack.c.bf16 %v315_v1, %v314_v6  ;;  %v289_v35 = vadd.f32 %v1344_v0, %v288_v32  ;;  %v331_v47 = vmax.f32 %v297_v45, 0.0  ;;  %v1146_v0 = vld [vmem:[%s1607_s5] sm:$0xff]  }
  0xe8   :  { %1094 = vmatprep.subr.bf16.mxu0 %v1146_v0 }
  0xe9   :  { %v338_v7 = vpack.c.bf16 %v313_v5, %v312_v4  ;;  %v329_v39 = vmax.f32 %v289_v35, 0.0  ;;  %v347_v48 = vpack.c.bf16 %v331_v47, %v330_v46  ;;  %1095 = vmatpush3.bf16.msra.mxu0 %v1146_v0 }
  0xeb   :  { %1060 = vmatprep.mubr.bf16.mxu1 %v338_v7  ;;  %v346_v42 = vpack.c.bf16 %v329_v39, %v328_v29 }
  0xec   :  { %1061 = vmatmul.mubr.bf16.gmra.mxu1 %v339_v13 }
  0xed   :  { %1064 = vmatprep.mubr.bf16.mxu1 %v340_v8 }
  0xf4   :  { %1065 = vmatmul.mubr.bf16.gmra.mxu1 %v341_v25 }
  0xf5   :  { %1068 = vmatprep.mubr.bf16.mxu1 %v342_v22 }
  0xfc   :  { %1069 = vmatmul.mubr.bf16.gmra.mxu1 %v343_v36 }
  0xfd   :  { %1072 = vmatprep.mubr.bf16.mxu1 %v344_v33 }
 0x104   :  { %1073 = vmatmul.mubr.bf16.gmra.mxu1 %v345_v43 }
 0x105   :  { %1076 = vmatprep.mubr.bf16.mxu1 %v346_v42 }
 0x10c   :  { %1077 = vmatmul.mubr.bf16.gmra.mxu1 %v347_v48 }
 0x194   :  { %v1050_v50 = vpop.f32.mrf.mxu1 }
 0x195   :  { %v462_v56 = vadd.f32 %v1050_v50, %v1405_v52 }
 0x196   :  { %v453_v51 = vpop.f32.mrf.mxu1 }
 0x197   :  { %v454_v54 = vadd.f32 %v1405_v52, %v453_v51  ;;  %v582_v63 = vmax.f32 %v462_v56, 0.0 }
 0x198   :  { %v1051_v53 = vpop.f32.mrf.mxu1 }
 0x199   :  { %v465_v55 = vadd.f32 %v1051_v53, %v1405_v52  ;;  %v580_v61 = vmax.f32 %v454_v54, 0.0 }
 0x19a   :  { %v456_v57 = vpop.f32.mrf.mxu1 }
 0x19b   :  { %v457_v58 = vadd.f32 %v1405_v52, %v456_v57  ;;  %v583_v59 = vmax.f32 %v465_v55, 0.0 }
 0x19c   :  { %v1054_v60 = vpop.f32.mrf.mxu1 }
 0x19d   :  { %v581_v62 = vmax.f32 %v457_v58, 0.0  ;;  %v613_v4 = vpack.c.bf16 %v583_v59, %v582_v63  ;;  %v478_v8 = vadd.f32 %v1054_v60, %v1405_v52 }
 0x19e   :  { %v469_v1 = vpop.f32.mrf.mxu1 }
 0x19f   :  { %v612_v3 = vpack.c.bf16 %v581_v62, %v580_v61  ;;  %v470_v6 = vadd.f32 %v1405_v52, %v469_v1  ;;  %v586_v16 = vmax.f32 %v478_v8, 0.0 }
 0x1a0   :  { %v1055_v5 = vpop.f32.mrf.mxu1 }
 0x1a1   :  { %v481_v7 = vadd.f32 %v1055_v5, %v1405_v52  ;;  %1096 = vmatprep.mubr.bf16.mxu0 %v612_v3  ;;  %v584_v14 = vmax.f32 %v470_v6, 0.0 }
 0x1a2   :  { %v472_v9 = vpop.f32.mrf.mxu1  ;;  %1097 = vmatmul.mubr.bf16.vlgmr.msra.gmra.mxu0 %v613_v4 }
 0x1a3   :  { %v473_v10 = vadd.f32 %v1405_v52, %v472_v9  ;;  %v587_v12 = vmax.f32 %v481_v7, 0.0 }
 0x1a4   :  { %v1058_v13 = vpop.f32.mrf.mxu1 }
 0x1a5   :  { %v585_v15 = vmax.f32 %v473_v10, 0.0  ;;  %v615_v19 = vpack.c.bf16 %v587_v12, %v586_v16  ;;  %v494_v24 = vadd.f32 %v1058_v13, %v1405_v52 }
 0x1a6   :  { %v485_v17 = vpop.f32.mrf.mxu1 }
 0x1a7   :  { %v614_v18 = vpack.c.bf16 %v585_v15, %v584_v14  ;;  %v486_v22 = vadd.f32 %v1405_v52, %v485_v17  ;;  %v590_v30 = vmax.f32 %v494_v24, 0.0 }
 0x1a8   :  { %v1059_v21 = vpop.f32.mrf.mxu1 }
 0x1a9   :  { %v497_v23 = vadd.f32 %v1059_v21, %v1405_v52  ;;  %1100 = vmatprep.mubr.bf16.mxu0 %v614_v18  ;;  %v588_v27 = vmax.f32 %v486_v22, 0.0 }
 0x1aa   :  { %v488_v25 = vpop.f32.mrf.mxu1  ;;  %1101 = vmatmul.mubr.bf16.gmra.mxu0 %v615_v19 }
 0x1ab   :  { %v489_v2 = vadd.f32 %v1405_v52, %v488_v25  ;;  %v591_v11 = vmax.f32 %v497_v23, 0.0 }
 0x1ac   :  { %v1062_v26 = vpop.f32.mrf.mxu1 }
 0x1ad   :  { %v589_v28 = vmax.f32 %v489_v2, 0.0  ;;  %v617_v33 = vpack.c.bf16 %v591_v11, %v590_v30  ;;  %v510_v20 = vadd.f32 %v1062_v26, %v1405_v52 }
 0x1ae   :  { %v501_v31 = vpop.f32.mrf.mxu1 }
 0x1af   :  { %v616_v32 = vpack.c.bf16 %v589_v28, %v588_v27  ;;  %v502_v35 = vadd.f32 %v1405_v52, %v501_v31  ;;  %v594_v43 = vmax.f32 %v510_v20, 0.0 }
 0x1b0   :  { %v1063_v34 = vpop.f32.mrf.mxu1 }
 0x1b1   :  { %v513_v36 = vadd.f32 %v1063_v34, %v1405_v52  ;;  %1104 = vmatprep.mubr.bf16.mxu0 %v616_v32  ;;  %v592_v41 = vmax.f32 %v502_v35, 0.0 }
 0x1b2   :  { %v504_v37 = vpop.f32.mrf.mxu1  ;;  %1105 = vmatmul.mubr.bf16.gmra.mxu0 %v617_v33 }
 0x1b3   :  { %v505_v29 = vadd.f32 %v1405_v52, %v504_v37  ;;  %v595_v39 = vmax.f32 %v513_v36, 0.0 }
 0x1b4   :  { %v1066_v40 = vpop.f32.mrf.mxu1 }
 0x1b5   :  { %v593_v42 = vmax.f32 %v505_v29, 0.0  ;;  %v619_v46 = vpack.c.bf16 %v595_v39, %v594_v43  ;;  %v526_v49 = vadd.f32 %v1066_v40, %v1405_v52  ;;  %v1442_v29 = vld [vmem:[%s1610_s6] ss:$0 sm:$0xff] }
 0x1b6   :  { %v517_v44 = vpop.f32.mrf.mxu1 }
 0x1b7   :  { %v618_v45 = vpack.c.bf16 %v593_v42, %v592_v41  ;;  %v518_v48 = vadd.f32 %v1405_v52, %v517_v44  ;;  %v598_v56 = vmax.f32 %v526_v49, 0.0 }
 0x1b8   :  { %v1067_v47 = vpop.f32.mrf.mxu1 }
 0x1b9   :  { %v529_v38 = vadd.f32 %v1067_v47, %v1405_v52  ;;  %1108 = vmatprep.mubr.bf16.mxu0 %v618_v45  ;;  %v596_v54 = vmax.f32 %v518_v48, 0.0 }
 0x1ba   :  { %v520_v0 = vpop.f32.mrf.mxu1  ;;  %1109 = vmatmul.mubr.bf16.gmra.mxu0 %v619_v46 }
 0x1bb   :  { %v521_v50 = vadd.f32 %v1405_v52, %v520_v0  ;;  %v599_v51 = vmax.f32 %v529_v38, 0.0 }
 0x1bc   :  { %v1070_v53 = vpop.f32.mrf.mxu1 }
 0x1bd   :  { %v597_v55 = vmax.f32 %v521_v50, 0.0  ;;  %v621_v59 = vpack.c.bf16 %v599_v51, %v598_v56  ;;  %v542_v63 = vadd.f32 %v1070_v53, %v1405_v52 }
 0x1be   :  { %v533_v57 = vpop.f32.mrf.mxu1 }
 0x1bf   :  { %v620_v58 = vpack.c.bf16 %v597_v55, %v596_v54  ;;  %v534_v61 = vadd.f32 %v1405_v52, %v533_v57  ;;  %v602_v8 = vmax.f32 %v542_v63, 0.0 }
 0x1c0   :  { %v1071_v60 = vpop.f32.mrf.mxu1 }
 0x1c1   :  { %v545_v62 = vadd.f32 %v1071_v60, %v1405_v52  ;;  %1112 = vmatprep.mubr.bf16.mxu0 %v620_v58  ;;  %v600_v6 = vmax.f32 %v534_v61, 0.0 }
 0x1c2   :  { %v536_v1 = vpop.f32.mrf.mxu1  ;;  %1113 = vmatmul.mubr.bf16.gmra.mxu0 %v621_v59 }
 0x1c3   :  { %v537_v3 = vadd.f32 %v1405_v52, %v536_v1  ;;  %v603_v4 = vmax.f32 %v545_v62, 0.0 }
 0x1c4   :  { %v1074_v5 = vpop.f32.mrf.mxu1 }
 0x1c5   :  { %v601_v7 = vmax.f32 %v537_v3, 0.0  ;;  %v623_v12 = vpack.c.bf16 %v603_v4, %v602_v8  ;;  %v558_v16 = vadd.f32 %v1074_v5, %v1405_v52 }
 0x1c6   :  { %v549_v9 = vpop.f32.mrf.mxu1 }
 0x1c7   :  { %v622_v10 = vpack.c.bf16 %v601_v7, %v600_v6  ;;  %v550_v14 = vadd.f32 %v1405_v52, %v549_v9  ;;  %v606_v24 = vmax.f32 %v558_v16, 0.0 }
 0x1c8   :  { %v1075_v13 = vpop.f32.mrf.mxu1 }
 0x1c9   :  { %v561_v15 = vadd.f32 %v1075_v13, %v1405_v52  ;;  %1116 = vmatprep.mubr.bf16.mxu0 %v622_v10  ;;  %v604_v22 = vmax.f32 %v550_v14, 0.0 }
 0x1ca   :  { %v552_v17 = vpop.f32.mrf.mxu1  ;;  %1117 = vmatmul.mubr.bf16.gmra.mxu0 %v623_v12 }
 0x1cb   :  { %v553_v18 = vadd.f32 %v1405_v52, %v552_v17  ;;  %v607_v19 = vmax.f32 %v561_v15, 0.0 }
 0x1cc   :  { %v1078_v21 = vpop.f32.mrf.mxu1 }
 0x1cd   :  { %v605_v23 = vmax.f32 %v553_v18, 0.0  ;;  %v625_v11 = vpack.c.bf16 %v607_v19, %v606_v24  ;;  %v574_v30 = vadd.f32 %v1078_v21, %v1405_v52 }
 0x1ce   :  { %v565_v25 = vpop.f32.mrf.mxu1 }
 0x1cf   :  { %v624_v2 = vpack.c.bf16 %v605_v23, %v604_v22  ;;  %v566_v27 = vadd.f32 %v1405_v52, %v565_v25  ;;  %v610_v36 = vmax.f32 %v574_v30, 0.0 }
 0x1d0   :  { %v1079_v26 = vpop.f32.mrf.mxu1 }
 0x1d1   :  { %v577_v28 = vadd.f32 %v1079_v26, %v1405_v52  ;;  %1120 = vmatprep.mubr.bf16.mxu0 %v624_v2  ;;  %v608_v34 = vmax.f32 %v566_v27, 0.0 }
 0x1d2   :  { %v568_v31 = vpop.f32.mrf.mxu1  ;;  %1121 = vmatmul.mubr.bf16.gmra.mxu0 %v625_v11 }
 0x1d3   :  { %v569_v32 = vadd.f32 %v1405_v52, %v568_v31  ;;  %v611_v33 = vmax.f32 %v577_v28, 0.0 }
 0x1d5   :  { %v609_v35 = vmax.f32 %v569_v32, 0.0  ;;  %v627_v37 = vpack.c.bf16 %v611_v33, %v610_v36 }
 0x1d7   :  { %v626_v20 = vpack.c.bf16 %v609_v35, %v608_v34 }
 0x1d9   :  { %1124 = vmatprep.mubr.bf16.mxu0 %v626_v20 }
 0x1da   :  { %1125 = vmatmul.mubr.bf16.gmra.mxu0 %v627_v37 }
 0x262   :  { %v1098_v39 = vpop.f32.mrf.mxu0 }
 0x263   :  { %v742_v40 = vadd.f32 %v1098_v39, %v1442_v29 }
 0x264   :  { %v733_v41 = vpop.f32.mrf.mxu0 }
 0x265   :  { %863 = vst.msk [vmem:[%s1611_s7 + $0x10] sm:$0xff] %vm860_vm1, %v742_v40  ;;  %v734_v52 = vadd.f32 %v1442_v29, %v733_v41 }
 0x266   :  { %v1099_v42 = vpop.f32.mrf.mxu0 }
 0x267   :  { %861 = vst.msk [vmem:[%s1611_s7] sm:$0xff] %vm860_vm1, %v734_v52  ;;  %v745_v43 = vadd.f32 %v1099_v42, %v1442_v29 }
 0x268   :  { %v736_v44 = vpop.f32.mrf.mxu0 }
 0x269   :  { %864 = vst.msk [vmem:[%s1611_s7 + $0x18] sm:$0xff] %vm860_vm1, %v745_v43  ;;  %v737_v45 = vadd.f32 %v1442_v29, %v736_v44 }
 0x26a   :  { %v1102_v46 = vpop.f32.mrf.mxu0 }
 0x26b   :  { %862 = vst.msk [vmem:[%s1611_s7 + $0x8] sm:$0xff] %vm860_vm1, %v737_v45  ;;  %v758_v47 = vadd.f32 %v1102_v46, %v1442_v29 }
 0x26c   :  { %v749_v48 = vpop.f32.mrf.mxu0 }
 0x26d   :  { %867 = vst.msk [vmem:[%s1611_s7 + $0x30] sm:$0xff] %vm860_vm1, %v758_v47  ;;  %v750_v38 = vadd.f32 %v1442_v29, %v749_v48 }
 0x26e   :  { %v1103_v49 = vpop.f32.mrf.mxu0 }
 0x26f   :  { %865 = vst.msk [vmem:[%s1611_s7 + $0x20] sm:$0xff] %vm860_vm1, %v750_v38  ;;  %v761_v0 = vadd.f32 %v1103_v49, %v1442_v29 }
 0x270   :  { %v752_v50 = vpop.f32.mrf.mxu0 }
 0x271   :  { %868 = vst.msk [vmem:[%s1611_s7 + $0x38] sm:$0xff] %vm860_vm1, %v761_v0  ;;  %v753_v51 = vadd.f32 %v1442_v29, %v752_v50 }
 0x272   :  { %v1106_v53 = vpop.f32.mrf.mxu0 }
 0x273   :  { %866 = vst.msk [vmem:[%s1611_s7 + $0x28] sm:$0xff] %vm860_vm1, %v753_v51  ;;  %v774_v54 = vadd.f32 %v1106_v53, %v1442_v29 }
 0x274   :  { %v765_v55 = vpop.f32.mrf.mxu0 }
 0x275   :  { %871 = vst.msk [vmem:[%s1611_s7 + $0x50] sm:$0xff] %vm860_vm1, %v774_v54  ;;  %v766_v56 = vadd.f32 %v1442_v29, %v765_v55 }
 0x276   :  { %v1107_v57 = vpop.f32.mrf.mxu0 }
 0x277   :  { %869 = vst.msk [vmem:[%s1611_s7 + $0x40] sm:$0xff] %vm860_vm1, %v766_v56  ;;  %v777_v58 = vadd.f32 %v1107_v57, %v1442_v29 }
 0x278   :  { %v768_v59 = vpop.f32.mrf.mxu0 }
 0x279   :  { %872 = vst.msk [vmem:[%s1611_s7 + $0x58] sm:$0xff] %vm860_vm1, %v777_v58  ;;  %v769_v60 = vadd.f32 %v1442_v29, %v768_v59 }
 0x27a   :  { %v1110_v61 = vpop.f32.mrf.mxu0 }
 0x27b   :  { %870 = vst.msk [vmem:[%s1611_s7 + $0x48] sm:$0xff] %vm860_vm1, %v769_v60  ;;  %v790_v62 = vadd.f32 %v1110_v61, %v1442_v29 }
 0x27c   :  { %v781_v63 = vpop.f32.mrf.mxu0 }
 0x27d   :  { %875 = vst.msk [vmem:[%s1611_s7 + $0x70] sm:$0xff] %vm860_vm1, %v790_v62  ;;  %v782_v1 = vadd.f32 %v1442_v29, %v781_v63 }
 0x27e   :  { %v1111_v3 = vpop.f32.mrf.mxu0 }
 0x27f   :  { %873 = vst.msk [vmem:[%s1611_s7 + $0x60] sm:$0xff] %vm860_vm1, %v782_v1  ;;  %v793_v4 = vadd.f32 %v1111_v3, %v1442_v29 }
 0x280   :  { %v784_v5 = vpop.f32.mrf.mxu0 }
 0x281   :  { %876 = vst.msk [vmem:[%s1611_s7 + $0x78] sm:$0xff] %vm860_vm1, %v793_v4  ;;  %v785_v6 = vadd.f32 %v1442_v29, %v784_v5 }
 0x282   :  { %v1114_v7 = vpop.f32.mrf.mxu0 }
 0x283   :  { %874 = vst.msk [vmem:[%s1611_s7 + $0x68] sm:$0xff] %vm860_vm1, %v785_v6  ;;  %v806_v8 = vadd.f32 %v1114_v7, %v1442_v29 }
 0x284   :  { %v797_v9 = vpop.f32.mrf.mxu0 }
 0x285   :  { %879 = vst.msk [vmem:[%s1611_s7 + $0x90] sm:$0xff] %vm860_vm1, %v806_v8  ;;  %v798_v10 = vadd.f32 %v1442_v29, %v797_v9 }
 0x286   :  { %v1115_v12 = vpop.f32.mrf.mxu0 }
 0x287   :  { %877 = vst.msk [vmem:[%s1611_s7 + $0x80] sm:$0xff] %vm860_vm1, %v798_v10  ;;  %v809_v13 = vadd.f32 %v1115_v12, %v1442_v29 }
 0x288   :  { %v800_v14 = vpop.f32.mrf.mxu0 }
 0x289   :  { %880 = vst.msk [vmem:[%s1611_s7 + $0x98] sm:$0xff] %vm860_vm1, %v809_v13  ;;  %v801_v15 = vadd.f32 %v1442_v29, %v800_v14 }
 0x28a   :  { %v1118_v16 = vpop.f32.mrf.mxu0 }
 0x28b   :  { %878 = vst.msk [vmem:[%s1611_s7 + $0x88] sm:$0xff] %vm860_vm1, %v801_v15  ;;  %v822_v17 = vadd.f32 %v1118_v16, %v1442_v29 }
 0x28c   :  { %v813_v18 = vpop.f32.mrf.mxu0 }
 0x28d   :  { %883 = vst.msk [vmem:[%s1611_s7 + $0xb0] sm:$0xff] %vm860_vm1, %v822_v17  ;;  %v814_v19 = vadd.f32 %v1442_v29, %v813_v18 }
 0x28e   :  { %v1119_v21 = vpop.f32.mrf.mxu0 }
 0x28f   :  { %881 = vst.msk [vmem:[%s1611_s7 + $0xa0] sm:$0xff] %vm860_vm1, %v814_v19  ;;  %v825_v22 = vadd.f32 %v1119_v21, %v1442_v29 }
 0x290   :  { %v816_v23 = vpop.f32.mrf.mxu0 }
 0x291   :  { %884 = vst.msk [vmem:[%s1611_s7 + $0xb8] sm:$0xff] %vm860_vm1, %v825_v22  ;;  %v817_v24 = vadd.f32 %v1442_v29, %v816_v23 }
 0x292   :  { %v1122_v25 = vpop.f32.mrf.mxu0 }
 0x293   :  { %882 = vst.msk [vmem:[%s1611_s7 + $0xa8] sm:$0xff] %vm860_vm1, %v817_v24  ;;  %v838_v2 = vadd.f32 %v1122_v25, %v1442_v29 }
 0x294   :  { %v829_v11 = vpop.f32.mrf.mxu0 }
 0x295   :  { %887 = vst.msk [vmem:[%s1611_s7 + $0xd0] sm:$0xff] %vm860_vm1, %v838_v2  ;;  %v830_v26 = vadd.f32 %v1442_v29, %v829_v11 }
 0x296   :  { %v1123_v27 = vpop.f32.mrf.mxu0 }
 0x297   :  { %885 = vst.msk [vmem:[%s1611_s7 + $0xc0] sm:$0xff] %vm860_vm1, %v830_v26  ;;  %v841_v28 = vadd.f32 %v1123_v27, %v1442_v29 }
 0x298   :  { %v832_v30 = vpop.f32.mrf.mxu0 }
 0x299   :  { %888 = vst.msk [vmem:[%s1611_s7 + $0xd8] sm:$0xff] %vm860_vm1, %v841_v28  ;;  %v833_v31 = vadd.f32 %v1442_v29, %v832_v30 }
 0x29a   :  { %v1126_v32 = vpop.f32.mrf.mxu0 }
 0x29b   :  { %886 = vst.msk [vmem:[%s1611_s7 + $0xc8] sm:$0xff] %vm860_vm1, %v833_v31  ;;  %v854_v33 = vadd.f32 %v1126_v32, %v1442_v29 }
 0x29c   :  { %v845_v34 = vpop.f32.mrf.mxu0 }
 0x29d   :  { %891 = vst.msk [vmem:[%s1611_s7 + $0xf0] sm:$0xff] %vm860_vm1, %v854_v33  ;;  %v846_v35 = vadd.f32 %v1442_v29, %v845_v34 }
 0x29e   :  { %v1127_v36 = vpop.f32.mrf.mxu0 }
 0x29f   :  { %889 = vst.msk [vmem:[%s1611_s7 + $0xe0] sm:$0xff] %vm860_vm1, %v846_v35  ;;  %v857_v20 = vadd.f32 %v1127_v36, %v1442_v29 }
 0x2a0   :  { %v848_v37 = vpop.f32.mrf.mxu0 }
 0x2a1   :  { %892 = vst.msk [vmem:[%s1611_s7 + $0xf8] sm:$0xff] %vm860_vm1, %v857_v20  ;;  %v849_v39 = vadd.f32 %v1442_v29, %v848_v37 }
 0x2a3   :  { %890 = vst.msk [vmem:[%s1611_s7 + $0xe8] sm:$0xff] %vm860_vm1, %v849_v39 }

</bundles_post_ra>
